<compile_context>
chip_gen: v6e
topology: v6e:2x2x1
jax: 0.10.0
libtpu: 0.0.40
codegen_flags: <defaults>
</compile_context>

<pallas_src>
import jax
import jax.numpy as jnp
from jax import lax
from jax.experimental import pallas as pl
from jax.experimental.pallas import tpu as pltpu

LANE = 128


def _round_up(v, m):
    return (v + m - 1) // m * m


def _choose_tiles(B, L, row_budget):
    """Pick (batch_tile, padded_batch).

    Bt is a multiple of 8 (so the (Bt, 128) output block is legal), sized so the
    flattened row count Bt*L stays within `row_budget` (keeps the f32
    intermediates comfortably inside VMEM on every generation, incl. v7x's
    64 MiB), and the grid always has >= 2 steps so the "parallel" batch axis can
    shard across both v7x TensorCores.
    """
    bt = max(8, (row_budget // max(L, 1)) // 8 * 8)
    bt = min(bt, _round_up(B, 8))
    bp = _round_up(B, bt)
    if bp // bt < 2:
        if bt > 8:
            bt = max(8, _round_up(bt // 2, 8))
            bp = _round_up(B, bt)
        if bp // bt < 2:
            bp = 2 * bt
    return bt, bp


def _make_kernels(Bt, L, K, T, E, KEp, Fp, Vp):
    """Returns (gather_kernel, slab_kernel) sharing the same fused conv/fc body."""
    R = Bt * L

    def _finish(x2d, wc, bc, wfc, bfc, out_ref):
        # x2d: (R, E) f32 embeddings for this tile, row order b*L + t.
        # In-kernel im2col: window[b*L+t] = concat_k emb[b, t+k, :].  The shifted
        # copies wrap inside the tile; wrapped rows only feed positions t >= T,
        # which are masked out below.  All shift work happens on the small (R, E)
        # slab, not on f32 (., 128) results.
        parts = [x2d]
        for k in range(1, K):
            parts.append(jnp.concatenate([x2d[k:, :], x2d[:k, :]], axis=0))
        if KEp > K * E:
            parts.append(jnp.zeros((R, KEp - K * E), jnp.float32))
        window = jnp.concatenate(parts, axis=-1).astype(jnp.bfloat16)     # (R, KEp)

        # Single contraction-KEp matmul replaces K depth-E matmuls (MXU filled).
        y = jnp.dot(window, wc, preferred_element_type=jnp.float32)       # (R, Fp)
        conv = jnp.maximum(y.reshape(Bt, L, Fp) + bc, 0.0)                # (Bt,L,Fp)

        # Positions t >= T are invalid (window ran past the sequence / wrapped):
        # zero them, which is the identity for a max over ReLU outputs.
        valid = lax.broadcasted_iota(jnp.int32, (L, Fp), 0) < T
        pooled = jnp.max(jnp.where(valid, conv, 0.0), axis=1)             # (Bt, Fp)

        # FC in bf16 (f32 accumulate); Cp is lane-dense.
        logits = jnp.dot(pooled.astype(jnp.bfloat16), wfc,
                         preferred_element_type=jnp.float32) + bfc        # (Bt, Cp)
        out_ref[...] = logits.astype(out_ref.dtype)

    def gather_kernel(ids_ref, tbl_ref, wc_ref, bc_ref, wfc_ref, bfc_ref, out_ref):
        # Fused embedding lookup: one-hot(ids) @ table on the MXU.  The gathered
        # (R, E) slab never touches HBM; only 4 bytes/token of ids are streamed.
        ids = ids_ref[...]                                                # (R, 1) i32
        onehot = jnp.where(
            ids == lax.broadcasted_iota(jnp.int32, (R, Vp), 1),
            1.0, 0.0).astype(jnp.bfloat16)                                # (R, Vp)
        x2d = jnp.dot(onehot, tbl_ref[...],
                      preferred_element_type=jnp.float32)                 # (R, E) f32
        _finish(x2d, wc_ref[...], bc_ref[...], wfc_ref[...], bfc_ref[...], out_ref)

    def slab_kernel(emb_ref, wc_ref, bc_ref, wfc_ref, bfc_ref, out_ref):
        _finish(emb_ref[...].astype(jnp.float32), wc_ref[...], bc_ref[...],
                wfc_ref[...], bfc_ref[...], out_ref)

    return gather_kernel, slab_kernel


def make_textcnn_forward(embed_table, conv_w, conv_b, fc_w, fc_b, kernel_size,
                         row_budget=8192, fuse_gather_max_vocab=512):
    """Packs weights once and returns a jitted forward(x) -> (B, n_class) logits."""
    V, E = embed_table.shape
    F = conv_w.shape[0]                       # conv_w: (F, 1, K, E)  torch layout
    K = int(kernel_size)
    C = fc_w.shape[0]                         # fc_w:   (C, F)        torch Linear
    KE = K * E
    Fp = _round_up(F, LANE)
    Cp = _round_up(C, LANE)
    KEp = _round_up(KE, LANE)

    # ---- one-time weight repack (hoisted out of the per-call path) ----
    wc = jnp.transpose(conv_w.reshape(F, KE), (1, 0))                     # (K*E, F)
    wc = jnp.pad(wc, ((0, KEp - KE), (0, Fp - F))).astype(jnp.bfloat16)   # (KEp, Fp)
    bc = jnp.pad(conv_b.reshape(1, F).astype(jnp.float32),
                 ((0, 0), (0, Fp - F)))                                   # (1, Fp)
    wfc = jnp.pad(fc_w.T, ((0, Fp - F), (0, Cp - C))).astype(jnp.bfloat16)  # (Fp, Cp)
    bfc = jnp.pad(fc_b.reshape(1, C).astype(jnp.float32),
                  ((0, 0), (0, Cp - C)))                                  # (1, Cp)

    fuse_gather = V <= fuse_gather_max_vocab
    if fuse_gather:
        Vp = _round_up(V, LANE)
        table = jnp.pad(embed_table, ((0, Vp - V), (0, 0))).astype(jnp.bfloat16)
    else:
        Vp = 0
        table = embed_table.astype(jnp.bfloat16)

    @jax.jit
    def forward(x):
        B, L = x.shape
        T = L - K + 1
        Bt, Bp = _choose_tiles(B, L, row_budget)
        grid = Bp // Bt
        R = Bt * L

        xi = x.astype(jnp.int32)
        if Bp != B:
            xi = jnp.pad(xi, ((0, Bp - B), (0, 0)))   # padded rows use token id 0

        gather_kernel, slab_kernel = _make_kernels(Bt, L, K, T, E, KEp, Fp, Vp)

        weight_specs = [
            pl.BlockSpec((KEp, Fp), lambda i: (0, 0)),   # im2col conv weight
            pl.BlockSpec((1, Fp), lambda i: (0, 0)),     # conv bias
            pl.BlockSpec((Fp, Cp), lambda i: (0, 0)),    # fc weight (bf16)
            pl.BlockSpec((1, Cp), lambda i: (0, 0)),     # fc bias
        ]

        if fuse_gather:
            kernel = gather_kernel
            ids = xi.reshape(Bp * L, 1)
            in_specs = [pl.BlockSpec((R, 1), lambda i: (i, 0)),   # token ids
                        pl.BlockSpec((Vp, E), lambda i: (0, 0)),  # resident table
                        ] + weight_specs
            args = (ids, table, wc, bc, wfc, bfc)
        else:
            # Large-vocab fallback: gather on host, stream the bf16 slab.
            kernel = slab_kernel
            emb2d = table[xi].reshape(Bp * L, E)
            in_specs = [pl.BlockSpec((R, E), lambda i: (i, 0),
                                     pipeline_mode=pl.Buffered(3)),
                        ] + weight_specs
            args = (emb2d, wc, bc, wfc, bfc)

        out_padded = pl.pallas_call(
            kernel,
            out_shape=jax.ShapeDtypeStruct((Bp, Cp), jnp.float32),
            grid_spec=pltpu.PrefetchScalarGridSpec(
                num_scalar_prefetch=0,
                grid=(grid,),
                in_specs=in_specs,
                out_specs=pl.BlockSpec((Bt, Cp), lambda i: (i, 0)),
            ),
            compiler_params=pltpu.CompilerParams(
                dimension_semantics=("parallel",),
                vmem_limit_bytes=48 * 1024 * 1024,   # under v7x's 64 MiB physical
            ),
        )(*args)
        return out_padded[:B, :C]

    return forward


def reference_forward(x, embed_table, conv_w, conv_b, fc_w, fc_b, kernel_size):
    """Pure-JAX reference mirroring the PyTorch forward (eval mode).

    Inputs to both matmuls are rounded to bf16 (matching the kernel's
    bf16-in / f32-accumulate MXU semantics) but all math is f32.
    """
    B, L = x.shape
    F, _, K, E = conv_w.shape
    T = L - K + 1
    hi = jax.lax.Precision.HIGHEST
    emb = embed_table.astype(jnp.bfloat16).astype(jnp.float32)[x]         # (B, L, E)
    cw = conv_w.astype(jnp.bfloat16).astype(jnp.float32).reshape(F, K * E)
    outs = []
    for t in range(T):
        window = emb[:, t:t + K, :].reshape(B, K * E)
        outs.append(jnp.dot(window, cw.T, precision=hi) + conv_b)
    conv = jnp.maximum(jnp.stack(outs, axis=2), 0.0)                      # (B, F, T)
    pooled = jnp.max(conv, axis=2)                                        # (B, F)
    pooled = pooled.astype(jnp.bfloat16).astype(jnp.float32)
    fw = fc_w.T.astype(jnp.bfloat16).astype(jnp.float32)
    return jnp.dot(pooled, fw, precision=hi) + fc_b                       # (B, C)


if __name__ == "__main__":
    # Small config consistent with the module
    vocab_size = 50
    embedding_dim = 32
    num_filters = 8
    kernel_size = 3
    n_class = 4
    B, L = 2, 16

    key = jax.random.PRNGKey(0)
    k_emb, k_cw, k_cb, k_fw, k_fb, k_x = jax.random.split(key, 6)

    embed_table = jax.random.normal(k_emb, (vocab_size, embedding_dim),
                                    dtype=jnp.float32)
    conv_w = 0.1 * jax.random.normal(
        k_cw, (num_filters, 1, kernel_size, embedding_dim), dtype=jnp.float32)
    conv_b = 0.1 * jax.random.normal(k_cb, (num_filters,), dtype=jnp.float32)
    fc_w = 0.1 * jax.random.normal(k_fw, (n_class, num_filters),
                                   dtype=jnp.float32)
    fc_b = 0.1 * jax.random.normal(k_fb, (n_class,), dtype=jnp.float32)

    x = jax.random.randint(k_x, (B, L), 0, vocab_size, dtype=jnp.int32)

    forward = make_textcnn_forward(embed_table, conv_w, conv_b, fc_w, fc_b,
                                   kernel_size)
    out = jax.block_until_ready(forward(x))

    ref = reference_forward(x, embed_table, conv_w, conv_b, fc_w, fc_b,
                            kernel_size)
    assert out.shape == (B, n_class), out.shape
    assert jnp.allclose(out, ref, atol=1e-2, rtol=1e-2), (out, ref)

    print("KERNEL_OK")
</pallas_src>

<mosaic_0001>
module attributes {stable_mosaic.version = 11 : i64} {
  func.func @gather_kernel(%arg0: i32, %arg1: memref<128x1xi32, #tpu.memory_space<vmem>>, %arg2: memref<128x32xbf16, #tpu.memory_space<vmem>>, %arg3: memref<128x128xbf16, #tpu.memory_space<vmem>>, %arg4: memref<1x128xf32, #tpu.memory_space<vmem>>, %arg5: memref<128x128xbf16, #tpu.memory_space<vmem>>, %arg6: memref<1x128xf32, #tpu.memory_space<vmem>>, %arg7: memref<8x128xf32, #tpu.memory_space<vmem>>) attributes {dimension_semantics = [#tpu.dimension_semantics<parallel>], iteration_bounds = array<i64: 2>, scalar_prefetch = 0 : i64, scratch_operands = 0 : i64, tpu.core_type = #tpu.core_type<tc>, window_params = [{transform_indices = @transform_0, window_bounds = array<i64: 128, 1>}, {pipeline_mode = #tpu.pipeline_mode<synchronous>, transform_indices = @transform_1, window_bounds = array<i64: 128, 32>}, {pipeline_mode = #tpu.pipeline_mode<synchronous>, transform_indices = @transform_2, window_bounds = array<i64: 128, 128>}, {pipeline_mode = #tpu.pipeline_mode<synchronous>, transform_indices = @transform_3, window_bounds = array<i64: 1, 128>}, {pipeline_mode = #tpu.pipeline_mode<synchronous>, transform_indices = @transform_4, window_bounds = array<i64: 128, 128>}, {pipeline_mode = #tpu.pipeline_mode<synchronous>, transform_indices = @transform_5, window_bounds = array<i64: 1, 128>}, {transform_indices = @transform_6, window_bounds = array<i64: 8, 128>}]} {
    %c0 = arith.constant 0 : index
    %c0_0 = arith.constant 0 : index
    %0 = vector.load %arg1[%c0, %c0_0] : memref<128x1xi32, #tpu.memory_space<vmem>>, vector<128x1xi32>
    %1 = tpu.iota {dimensions = array<i32: 1>} : vector<128x128xi32>
    %2 = vector.broadcast %0 : vector<128x1xi32> to vector<128x128xi32>
    %3 = arith.cmpi eq, %2, %1 : vector<128x128xi32>
    %cst = arith.constant 1.000000e+00 : f32
    %cst_1 = arith.constant 0.000000e+00 : f32
    %4 = vector.broadcast %cst : f32 to vector<128x128xf32>
    %5 = vector.broadcast %cst_1 : f32 to vector<128x128xf32>
    %6 = arith.select %3, %4, %5 : vector<128x128xi1>, vector<128x128xf32>
    %7 = arith.truncf %6 : vector<128x128xf32> to vector<128x128xbf16>
    %c0_2 = arith.constant 0 : index
    %c0_3 = arith.constant 0 : index
    %8 = vector.load %arg2[%c0_2, %c0_3] : memref<128x32xbf16, #tpu.memory_space<vmem>>, vector<128x32xbf16>
    %cst_4 = arith.constant dense<0.000000e+00> : vector<128x32xf32>
    %9 = tpu.matmul %7, %8, %cst_4 {dimension_numbers = #tpu.dot_dimension_numbers<[1], [0], [0], [1], [0, 0, 1, 1], [], []>} : vector<128x128xbf16>, vector<128x32xbf16>, vector<128x32xf32> -> vector<128x32xf32>
    %c0_5 = arith.constant 0 : index
    %c0_6 = arith.constant 0 : index
    %10 = vector.load %arg3[%c0_5, %c0_6] : memref<128x128xbf16, #tpu.memory_space<vmem>>, vector<128x128xbf16>
    %c0_7 = arith.constant 0 : index
    %c0_8 = arith.constant 0 : index
    %11 = vector.load %arg4[%c0_7, %c0_8] : memref<1x128xf32, #tpu.memory_space<vmem>>, vector<1x128xf32>
    %c0_9 = arith.constant 0 : index
    %c0_10 = arith.constant 0 : index
    %12 = vector.load %arg5[%c0_9, %c0_10] : memref<128x128xbf16, #tpu.memory_space<vmem>>, vector<128x128xbf16>
    %c0_11 = arith.constant 0 : index
    %c0_12 = arith.constant 0 : index
    %13 = vector.load %arg6[%c0_11, %c0_12] : memref<1x128xf32, #tpu.memory_space<vmem>>, vector<1x128xf32>
    %14 = vector.extract_strided_slice %9 {offsets = [1, 0], sizes = [127, 32], strides = [1, 1]} : vector<128x32xf32> to vector<127x32xf32>
    %15 = vector.extract_strided_slice %9 {offsets = [0, 0], sizes = [1, 32], strides = [1, 1]} : vector<128x32xf32> to vector<1x32xf32>
    %16 = tpu.concatenate %14, %15 in 0 : vector<127x32xf32>, vector<1x32xf32> -> vector<128x32xf32>
    %17 = vector.extract_strided_slice %9 {offsets = [2, 0], sizes = [126, 32], strides = [1, 1]} : vector<128x32xf32> to vector<126x32xf32>
    %18 = vector.extract_strided_slice %9 {offsets = [0, 0], sizes = [2, 32], strides = [1, 1]} : vector<128x32xf32> to vector<2x32xf32>
    %19 = tpu.concatenate %17, %18 in 0 : vector<126x32xf32>, vector<2x32xf32> -> vector<128x32xf32>
    %cst_13 = arith.constant 0.000000e+00 : f32
    %20 = vector.broadcast %cst_13 : f32 to vector<128x32xf32>
    %21 = tpu.concatenate %9, %16, %19, %20 in 1 : vector<128x32xf32>, vector<128x32xf32>, vector<128x32xf32>, vector<128x32xf32> -> vector<128x128xf32>
    %22 = arith.truncf %21 : vector<128x128xf32> to vector<128x128xbf16>
    %cst_14 = arith.constant dense<0.000000e+00> : vector<128x128xf32>
    %23 = tpu.matmul %22, %10, %cst_14 {dimension_numbers = #tpu.dot_dimension_numbers<[1], [0], [0], [1], [0, 0, 1, 1], [], []>} : vector<128x128xbf16>, vector<128x128xbf16>, vector<128x128xf32> -> vector<128x128xf32>
    %24 = vector.shape_cast %23 : vector<128x128xf32> to vector<8x16x128xf32>
    %25 = vector.shape_cast %11 : vector<1x128xf32> to vector<1x1x128xf32>
    %26 = vector.broadcast %25 : vector<1x1x128xf32> to vector<8x16x128xf32>
    %27 = arith.addf %24, %26 : vector<8x16x128xf32>
    %cst_15 = arith.constant 0.000000e+00 : f32
    %28 = vector.broadcast %cst_15 : f32 to vector<8x16x128xf32>
    %29 = arith.maximumf %27, %28 : vector<8x16x128xf32>
    %30 = tpu.iota {dimensions = array<i32: 0>} : vector<16x128xi32>
    %c14_i32 = arith.constant 14 : i32
    %31 = vector.broadcast %c14_i32 : i32 to vector<16x128xi32>
    %32 = arith.cmpi slt, %30, %31 : vector<16x128xi32>
    %cst_16 = arith.constant 0.000000e+00 : f32
    %33 = vector.shape_cast %32 : vector<16x128xi1> to vector<1x16x128xi1>
    %34 = vector.broadcast %33 : vector<1x16x128xi1> to vector<8x16x128xi1>
    %35 = vector.broadcast %cst_16 : f32 to vector<8x16x128xf32>
    %36 = arith.select %34, %29, %35 : vector<8x16x128xi1>, vector<8x16x128xf32>
    %cst_17 = arith.constant dense<0xFF800000> : vector<8x128xf32>
    %37 = vector.multi_reduction <maximumf>, %36, %cst_17 [1] : vector<8x16x128xf32> to vector<8x128xf32>
    %38 = arith.truncf %37 : vector<8x128xf32> to vector<8x128xbf16>
    %cst_18 = arith.constant dense<0.000000e+00> : vector<8x128xf32>
    %39 = tpu.matmul %38, %12, %cst_18 {dimension_numbers = #tpu.dot_dimension_numbers<[1], [0], [0], [1], [0, 0, 1, 1], [], []>} : vector<8x128xbf16>, vector<128x128xbf16>, vector<8x128xf32> -> vector<8x128xf32>
    %40 = vector.broadcast %13 : vector<1x128xf32> to vector<8x128xf32>
    %41 = arith.addf %39, %40 : vector<8x128xf32>
    %c0_19 = arith.constant 0 : index
    %c0_20 = arith.constant 0 : index
    %42 = vector.load %arg7[%c0_19, %c0_20] : memref<8x128xf32, #tpu.memory_space<vmem>>, vector<8x128xf32>
    tpu.vector_store %arg7[%c0_19, %c0_20], %41 {strides = array<i32>} : memref<8x128xf32, #tpu.memory_space<vmem>>, vector<8x128xf32>,
    return
  }
  func.func @transform_0(%arg0: i32) -> (i32, i32) {
    %c0_i32 = arith.constant 0 : i32
    %c0_i32_0 = arith.constant 0 : i32
    return %arg0, %c0_i32 : i32, i32
  }
  func.func @transform_1(%arg0: i32) -> (i32, i32) {
    %c0_i32 = arith.constant 0 : i32
    %c0_i32_0 = arith.constant 0 : i32
    %c0_i32_1 = arith.constant 0 : i32
    return %c0_i32, %c0_i32_0 : i32, i32
  }
  func.func @transform_2(%arg0: i32) -> (i32, i32) {
    %c0_i32 = arith.constant 0 : i32
    %c0_i32_0 = arith.constant 0 : i32
    %c0_i32_1 = arith.constant 0 : i32
    return %c0_i32, %c0_i32_0 : i32, i32
  }
  func.func @transform_3(%arg0: i32) -> (i32, i32) {
    %c0_i32 = arith.constant 0 : i32
    %c0_i32_0 = arith.constant 0 : i32
    %c0_i32_1 = arith.constant 0 : i32
    return %c0_i32, %c0_i32_0 : i32, i32
  }
  func.func @transform_4(%arg0: i32) -> (i32, i32) {
    %c0_i32 = arith.constant 0 : i32
    %c0_i32_0 = arith.constant 0 : i32
    %c0_i32_1 = arith.constant 0 : i32
    return %c0_i32, %c0_i32_0 : i32, i32
  }
  func.func @transform_5(%arg0: i32) -> (i32, i32) {
    %c0_i32 = arith.constant 0 : i32
    %c0_i32_0 = arith.constant 0 : i32
    %c0_i32_1 = arith.constant 0 : i32
    return %c0_i32, %c0_i32_0 : i32, i32
  }
  func.func @transform_6(%arg0: i32) -> (i32, i32) {
    %c0_i32 = arith.constant 0 : i32
    %c0_i32_0 = arith.constant 0 : i32
    return %arg0, %c0_i32 : i32, i32
  }
}

</mosaic_0001>

<bundles_post_ra>
// kernel: forward.1
= control target key start
LH: loop header
LB: loop body
LE: loop exit
PB: predicated region body
PF: predicated region fallthrough
CT: control target
= control target key end

     0   :  { %s1619_s21 = smov 0   ;;  %s1964_s0 = inlined_call_operand.vmem [shape: s32[256,1], index: 0, kind: input, shape index: {}]   ;;  %s1965_s1 = inlined_call_operand.vmem [shape: bf16[128,32], index: 1, kind: input, shape index: {}]   ;;  %s1966_s2 = inlined_call_operand.vmem [shape: bf16[128,128], index: 2, kind: input, shape index: {}]   ;;  %s1967_s3 = inlined_call_operand.vmem [shape: f32[1,128], index: 3, kind: input, shape index: {}]   ;;  %s1968_s4 = inlined_call_operand.vmem [shape: bf16[128,128], index: 4, kind: input, shape index: {}]   ;;  %s1969_s5 = inlined_call_operand.vmem [shape: f32[1,128], index: 5, kind: input, shape index: {}]   ;;  %s1970_s6 = inlined_call_operand.vmem [shape: f32[16,128], index: 6, kind: output, shape index: {}]  }
   0x1 LB: > { %s1625_s22 = sadd.s32 4294967295, %s1576_s21   ;;  %p1253_p0 = scmp.ge.s32.totalorder %s1576_s21, 1  ;;  %s1576_s21 = sphi %s1619_s21, %s16_s21  }
   0x2   : > { %p213_p1 = scmp.lt.s32.totalorder %s1576_s21, 3 }
   0x4   : > { %p214_p2 = pnand %p1253_p0, %p213_p1 }
   0x5   : > { %s1254_s23 = sshll.u32 (!%p214_p2), %s1625_s22, 4  ;;  %s1580_s14 = smov (!%p214_p2), 32  }
   0x6   : > { %217 = sbr.rel (%p214_p2) target bundleno = 928 (0x3a0), region = 44  ;;  %p243_p3 = scmp.lt.s32.totalorder (!%p214_p2), %s1254_s23, 31 }
   0x7   : > { %s1581_s15 = smov (!%p214_p2), 64   ;;  %p248_p4 = scmp.lt.s32.totalorder (!%p214_p2), %s1625_s22, 1 }
   0xb   : > { %v1578_v0 = vmov 0   ;;  %v1546_v1 = vld [vmem:[%s1965_s1 + $0x38] sm:$0xff]   ;;  %v1547_v2 = vld [vmem:[%s1965_s1 + $0x30] sm:$0xff]   ;;  %s1974_s23 = smov (!%p243_p3, %s1254_s23), 31  ;;  %v1548_v3 = vld [vmem:[%s1965_s1 + $0x28] sm:$0xff]   ;;  %v269_v25 = vlaneseq  ;;  %s1976_s22 = smov (!%p248_p4, %s1625_s22), 1 }
   0xc   : > { %1465 = vset.pattern.permute.xlu1 %v1578_v0  ;;  %1464 = vset.pattern.permute.xlu0 %v1578_v0  ;;  %s1255_s28 = sshll.u32 %s1974_s23, 3  ;;  %v1549_v8 = vld [vmem:[%s1965_s1 + $0x20] sm:$0xff]   ;;  %v1550_v10 = vld [vmem:[%s1965_s1 + $0x18] sm:$0xff]   ;;  %v1551_v14 = vld [vmem:[%s1965_s1 + $0x10] sm:$0xff]   ;;  %v1579_v31 = vmov 1.0|1.0  }
   0xd   : > { %1366 = vmatprep.subr.bf16.mxu0 %v1546_v1  ;;  %s1639_s7 = scalar_lea.vmem %s1964_s0, %s1255_s28  ;;  %v1552_v17 = vld [vmem:[%s1965_s1 + $0x8] sm:$0xff]   ;;  %v1553_v20 = vld [vmem:[%s1965_s1] sm:$0xff]   ;;  %v270_v28 = vand.u32 127, %v269_v25  ;;  %v1554_v44 = vld [vmem:[%s1966_s2 + $0x38] sm:$0xff]   ;;  %s1256_s12 = sshll.u32 %s1976_s22, 3 }
   0xe   : > { %1367 = vmatpush3.bf16.msra.mxu0 %v1546_v1  ;;  %v255_v4 = vld [vmem:[%s1639_s7 + $0x10] sm:$0xff]  ;;  %v253_v5 = vld [vmem:[%s1639_s7] sm:$0xff]  ;;  %v256_v6 = vld [vmem:[%s1639_s7 + $0x18] sm:$0xff]  ;;  %1398 = vmatprep.subr.bf16.mxu1 %v1554_v44  ;;  %s251_s17 = scalar_lea.vmem %s1970_s6, %s1256_s12 }
   0xf   : > { %1368 = vmatprep.subr.bf16.mxu0 %v1547_v2  ;;  %278 = vperm.xlu1 %1465, %v255_v4   ;;  %v254_v7 = vld [vmem:[%s1639_s7 + $0x8] sm:$0xff]  ;;  %v257_v11 = vld [vmem:[%s1639_s7 + $0x20] sm:$0xff]  ;;  %v260_v12 = vld [vmem:[%s1639_s7 + $0x38] sm:$0xff] }
  0x10   : > { %272 = vperm.xlu0 %1464, %v253_v5   ;;  %v258_v9 = vld [vmem:[%s1639_s7 + $0x28] sm:$0xff]  ;;  %v259_v13 = vld [vmem:[%s1639_s7 + $0x30] sm:$0xff]  ;;  %v261_v16 = vld [vmem:[%s1639_s7 + $0x40] sm:$0xff]  ;;  %1399 = vmatpush3.bf16.msra.mxu1 %v1554_v44 }
  0x11   : > { %v262_v15 = vld [vmem:[%s1639_s7 + $0x48] sm:$0xff]  ;;  %v264_v18 = vld [vmem:[%s1639_s7 + $0x58] sm:$0xff]  ;;  %v263_v19 = vld [vmem:[%s1639_s7 + $0x50] sm:$0xff] }
  0x12   : > { %1369 = vmatpush3.bf16.msra.mxu0 %v1547_v2  ;;  %v266_v21 = vld [vmem:[%s1639_s7 + $0x68] sm:$0xff]  ;;  %v265_v22 = vld [vmem:[%s1639_s7 + $0x60] sm:$0xff]  ;;  %v268_v23 = vld [vmem:[%s1639_s7 + $0x78] sm:$0xff] }
  0x13   : > { %1370 = vmatprep.subr.bf16.mxu0 %v1548_v3  ;;  %281 = vperm.xlu1 %1465, %v256_v6   ;;  %v267_v24 = vld [vmem:[%s1639_s7 + $0x70] sm:$0xff]  ;;  %v1556_v46 = vld [vmem:[%s1966_s2 + $0x28] sm:$0xff]   ;;  %v1557_v47 = vld [vmem:[%s1966_s2 + $0x20] sm:$0xff]  }
  0x14   : > { %275 = vperm.xlu0 %1464, %v254_v7   ;;  %v1555_v45 = vld [vmem:[%s1966_s2 + $0x30] sm:$0xff]   ;;  %v1558_v48 = vld [vmem:[%s1966_s2 + $0x18] sm:$0xff]   ;;  %v1560_v53 = vld [vmem:[%s1966_s2 + $0x8] sm:$0xff]  }
  0x15   : > { %1400 = vmatprep.subr.bf16.mxu1 %v1555_v45  ;;  %v1559_v49 = vld [vmem:[%s1966_s2 + $0x10] sm:$0xff]   ;;  %v1561_v61 = vld [vmem:[%s1966_s2] sm:$0xff]  }
  0x16   : > { %1371 = vmatpush3.bf16.msra.mxu0 %v1548_v3  ;;  %1401 = vmatpush3.bf16.msra.mxu1 %v1555_v45 }
  0x17   : > { %1372 = vmatprep.subr.bf16.mxu0 %v1549_v8  ;;  %287 = vperm.xlu1 %1465, %v258_v9  }
  0x18   : > { %284 = vperm.xlu0 %1464, %v257_v11   ;;  %1402 = vmatprep.subr.bf16.mxu1 %v1556_v46 }
  0x1a   : > { %1373 = vmatpush3.bf16.msra.mxu0 %v1549_v8  ;;  %1403 = vmatpush3.bf16.msra.mxu1 %v1556_v46 }
  0x1b   : > { %1374 = vmatprep.subr.bf16.mxu0 %v1550_v10  ;;  %293 = vperm.xlu1 %1465, %v260_v12  }
  0x1c   : > { %290 = vperm.xlu0 %1464, %v259_v13   ;;  %1404 = vmatprep.subr.bf16.mxu1 %v1557_v47 }
  0x1e   : > { %1375 = vmatpush3.bf16.msra.mxu0 %v1550_v10  ;;  %1405 = vmatpush3.bf16.msra.mxu1 %v1557_v47 }
  0x1f   : > { %1376 = vmatprep.subr.bf16.mxu0 %v1551_v14  ;;  %299 = vperm.xlu1 %1465, %v262_v15  }
  0x20   : > { %296 = vperm.xlu0 %1464, %v261_v16   ;;  %1406 = vmatprep.subr.bf16.mxu1 %v1558_v48 }
  0x22   : > { %1377 = vmatpush3.bf16.msra.mxu0 %v1551_v14  ;;  %1407 = vmatpush3.bf16.msra.mxu1 %v1558_v48 }
  0x23   : > { %1378 = vmatprep.subr.bf16.mxu0 %v1552_v17  ;;  %305 = vperm.xlu1 %1465, %v264_v18  }
  0x24   : > { %302 = vperm.xlu0 %1464, %v263_v19   ;;  %1408 = vmatprep.subr.bf16.mxu1 %v1559_v49 }
  0x26   : > { %1379 = vmatpush3.bf16.msra.mxu0 %v1552_v17  ;;  %1409 = vmatpush3.bf16.msra.mxu1 %v1559_v49 }
  0x27   : > { %1380 = vmatprep.subr.bf16.mxu0 %v1553_v20  ;;  %311 = vperm.xlu1 %1465, %v266_v21  }
  0x28   : > { %308 = vperm.xlu0 %1464, %v265_v22   ;;  %1410 = vmatprep.subr.bf16.mxu1 %v1560_v53 }
  0x2a   : > { %1381 = vmatpush3.bf16.msra.mxu0 %v1553_v20  ;;  %1411 = vmatpush3.bf16.msra.mxu1 %v1560_v53 }
  0x2b   : > { %317 = vperm.xlu1 %1465, %v268_v23   ;;  %1412 = vmatprep.subr.bf16.mxu1 %v1561_v61 }
  0x2c   : > { %314 = vperm.xlu0 %1464, %v267_v24  }
  0x2e   : > { %1413 = vmatpush3.bf16.msra.mxu1 %v1561_v61 }
  0x8a   : > { %v279_v26 = vpop.permute.xlu1 %278 }
  0x8b   : > { %v273_v27 = vpop.permute.xlu0 %272  ;;  %vm321_vm0 = vcmp.eq.s32.totalorder %v279_v26, %v270_v28 }
  0x8c   : > { %vm319_vm3 = vcmp.eq.s32.totalorder %v273_v27, %v270_v28 }
  0x8e   : > { %v282_v29 = vpop.permute.xlu1 %281 }
  0x8f   : > { %v276_v30 = vpop.permute.xlu0 %275  ;;  %vm322_vm1 = vcmp.eq.s32.totalorder %v282_v29, %v270_v28 }
  0x90   : > { %vm320_vm2 = vcmp.eq.s32.totalorder %v276_v30, %v270_v28  ;;  %vm1267_vm4 = vmpackc.low %vm322_vm1, %vm321_vm0 }
  0x91   : > { %vm1265_vm5 = vmpackc.low %vm320_vm2, %vm319_vm3 }
  0x92   : > { %1382 = vmatprep.mubr.msk.bf16.mxu0 %vm1265_vm5, %v1579_v31  ;;  %v288_v32 = vpop.permute.xlu1 %287 }
  0x93   : > { %v285_v33 = vpop.permute.xlu0 %284  ;;  %vm324_vm6 = vcmp.eq.s32.totalorder %v288_v32, %v270_v28  ;;  %1383 = vmatmul.mubr.msk.bf16.vlgmr.msra.gmra.mxu0 %vm1267_vm4, %v1579_v31 }
  0x94   : > { %vm323_vm7 = vcmp.eq.s32.totalorder %v285_v33, %v270_v28 }
  0x95   : > { %vm1269_vm8 = vmpackc.low %vm324_vm6, %vm323_vm7 }
  0x96   : > { %1386 = vmatprep.mubr.msk.bf16.mxu0 %vm1269_vm8, %v1579_v31  ;;  %v294_v34 = vpop.permute.xlu1 %293  ;;  %vm570_vm8 = vcmask 1046528  }
  0x97   : > { %v291_v35 = vpop.permute.xlu0 %290  ;;  %vm326_vm9 = vcmp.eq.s32.totalorder %v294_v34, %v270_v28 }
  0x98   : > { %vm325_vm10 = vcmp.eq.s32.totalorder %v291_v35, %v270_v28 }
  0x99   : > { %vm1271_vm11 = vmpackc.low %vm326_vm9, %vm325_vm10  ;;  %vm605_vm9 = vcmask 1045504   ;;  %vm738_vm10 = vcmask 261120  }
  0x9a   : > { %v300_v36 = vpop.permute.xlu1 %299 }
  0x9b   : > { %v297_v37 = vpop.permute.xlu0 %296  ;;  %vm328_vm12 = vcmp.eq.s32.totalorder %v300_v36, %v270_v28  ;;  %1387 = vmatmul.mubr.msk.bf16.gmra.mxu0 %vm1271_vm11, %v1579_v31  ;;  %vm755_vm11 = vcmask 523264  }
  0x9c   : > { %vm327_vm13 = vcmp.eq.s32.totalorder %v297_v37, %v270_v28 }
  0x9d   : > { %vm1273_vm14 = vmpackc.low %vm328_vm12, %vm327_vm13  ;;  %vm772_vm12 = vcmask 785408  }
  0x9e   : > { %1390 = vmatprep.mubr.msk.bf16.mxu0 %vm1273_vm14, %v1579_v31  ;;  %v306_v38 = vpop.permute.xlu1 %305  ;;  %vm1826_vm13 = vmpackc.low %vm772_vm12, %vm772_vm12  ;;  %vm1583_vm14 = vmmov 0  }
  0x9f   : > { %v303_v39 = vpop.permute.xlu0 %302  ;;  %vm330_vm15 = vcmp.eq.s32.totalorder %v306_v38, %v270_v28 }
  0xa0   : > { %vm329_vm0 = vcmp.eq.s32.totalorder %v303_v39, %v270_v28 }
  0xa1   : > { %vm1275_vm1 = vmpackc.low %vm330_vm15, %vm329_vm0  ;;  %vm1091_vm0 = vcmask 1041409  }
  0xa2   : > { %v312_v40 = vpop.permute.xlu1 %311 }
  0xa3   : > { %v309_v41 = vpop.permute.xlu0 %308  ;;  %vm332_vm2 = vcmp.eq.s32.totalorder %v312_v40, %v270_v28  ;;  %1391 = vmatmul.mubr.msk.bf16.gmra.mxu0 %vm1275_vm1, %v1579_v31  ;;  %vm1093_vm1 = vcmask 1042434  }
  0xa4   : > { %vm331_vm3 = vcmp.eq.s32.totalorder %v309_v41, %v270_v28 }
  0xa5   : > { %vm1277_vm4 = vmpackc.low %vm332_vm2, %vm331_vm3  ;;  %vm1095_vm2 = vcmask 1043459   ;;  %vm1097_vm3 = vcmask 1044484  }
  0xa6   : > { %1394 = vmatprep.mubr.msk.bf16.mxu0 %vm1277_vm4, %v1579_v31  ;;  %v318_v42 = vpop.permute.xlu1 %317  ;;  %vm1099_vm4 = vcmask 1045509  }
  0xa7   : > { %v315_v43 = vpop.permute.xlu0 %314  ;;  %vm334_vm5 = vcmp.eq.s32.totalorder %v318_v42, %v270_v28 }
  0xa8   : > { %vm333_vm6 = vcmp.eq.s32.totalorder %v315_v43, %v270_v28 }
  0xa9   : > { %vm1279_vm7 = vmpackc.low %vm334_vm5, %vm333_vm6  ;;  %vm1101_vm5 = vcmask 1046534   ;;  %vm1103_vm6 = vcmask 1047559  }
  0xab   : > { %1395 = vmatmul.mubr.msk.bf16.gmra.mxu0 %vm1279_vm7, %v1579_v31 }
 0x153   : > { %v1694_v50 = vpop.f32.mrf.mxu0 }
 0x154   : > { %v574_v55 = vrot.slane %v1694_v50, 1  ;;  %v609_v59 = vrot.slane %v1694_v50, 2 }
 0x155   : > { %v1696_v51 = vpop.f32.mrf.mxu0 }
 0x156   : > { %v571_v56 = vrot.slane %v1696_v51, 1  ;;  %v606_v62 = vrot.slane %v1696_v51, 2 }
 0x157   : > { %v1698_v52 = vpop.f32.mrf.mxu0 }
 0x158   : > { %v576_v63 = vrot.slane %v1698_v52, 1  ;;  %v611_v8 = vrot.slane %v1698_v52, 2 }
 0x159   : > { %v1703_v54 = vpop.f32.mrf.mxu0 }
 0x15a   : > { %v572_v57 = vrot.slane %v1703_v54, 1  ;;  %v607_v58 = vrot.slane %v1703_v54, 2  ;;  %v577_v10 = vsel %vm570_vm8, %v574_v55, %v576_v63  ;;  %v612_v20 = vsel %vm605_vm9, %v609_v59, %v611_v8 }
 0x15b   : > { %v1710_v60 = vpop.f32.mrf.mxu0 }
 0x15c   : > { %v573_v0 = vsel %vm570_vm8, %v571_v56, %v572_v57  ;;  %v575_v1 = vsel %vm570_vm8, %v572_v57, %v574_v55  ;;  %v608_v6 = vsel %vm605_vm9, %v606_v62, %v607_v58  ;;  %v610_v7 = vsel %vm605_vm9, %v607_v58, %v609_v59 }
 0x15d   : > { %v1721_v2 = vpop.f32.mrf.mxu0  ;;  %v1466_v3 = vpack.i.bf16 %v575_v1, %v573_v0  ;;  %v1471_v13 = vpack.i.bf16 %v610_v7, %v608_v6  ;;  %v582_v15 = vrot.slane %v1710_v60, 1  ;;  %v617_v21 = vrot.slane %v1710_v60, 2 }
 0x15e   : > { %v578_v4 = vrot.slane %v1721_v2, 1  ;;  %v613_v5 = vrot.slane %v1721_v2, 2 }
 0x15f   : > { %1467 = vrot.lane.b32.xlu0 %v1466_v3, %s1580_s14  ;;  %v1731_v9 = vpop.f32.mrf.mxu0 }
 0x160   : > { %v579_v11 = vsel %vm570_vm8, %v576_v63, %v578_v4  ;;  %v614_v18 = vsel %vm605_vm9, %v611_v8, %v613_v5  ;;  %v584_v22 = vrot.slane %v1731_v9, 1  ;;  %v619_v33 = vrot.slane %v1731_v9, 2 }
 0x161   : > { %v1735_v12 = vpop.f32.mrf.mxu0  ;;  %v1476_v14 = vpack.i.bf16 %v579_v11, %v577_v10  ;;  %v1481_v27 = vpack.i.bf16 %v614_v18, %v612_v20 }
 0x162   : > { %v580_v16 = vrot.slane %v1735_v12, 1  ;;  %v615_v17 = vrot.slane %v1735_v12, 2  ;;  %v585_v35 = vsel %vm570_vm8, %v582_v15, %v584_v22  ;;  %v620_v45 = vsel %vm605_vm9, %v617_v21, %v619_v33 }
 0x163   : > { %1472 = vrot.lane.b32.xlu0 %v1471_v13, %s1581_s15  ;;  %1477 = vrot.lane.b32.xlu1 %v1476_v14, %s1580_s14  ;;  %v1743_v19 = vpop.f32.mrf.mxu0 }
 0x164   : > { %v581_v23 = vsel %vm570_vm8, %v578_v4, %v580_v16  ;;  %v583_v24 = vsel %vm570_vm8, %v580_v16, %v582_v15  ;;  %v616_v31 = vsel %vm605_vm9, %v613_v5, %v615_v17  ;;  %v618_v32 = vsel %vm605_vm9, %v615_v17, %v617_v21 }
 0x165   : > { %v1750_v26 = vpop.f32.mrf.mxu0  ;;  %v1486_v28 = vpack.i.bf16 %v583_v24, %v581_v23  ;;  %v1491_v38 = vpack.i.bf16 %v618_v32, %v616_v31  ;;  %v590_v40 = vrot.slane %v1743_v19, 1  ;;  %v625_v46 = vrot.slane %v1743_v19, 2 }
 0x166   : > { %v586_v29 = vrot.slane %v1750_v26, 1  ;;  %v621_v30 = vrot.slane %v1750_v26, 2 }
 0x167   : > { %1482 = vrot.lane.b32.xlu1 %v1481_v27, %s1581_s15  ;;  %1487 = vrot.lane.b32.xlu0 %v1486_v28, %s1580_s14  ;;  %v1759_v34 = vpop.f32.mrf.mxu0 }
 0x168   : > { %v587_v36 = vsel %vm570_vm8, %v584_v22, %v586_v29  ;;  %v622_v43 = vsel %vm605_vm9, %v619_v33, %v621_v30  ;;  %v592_v47 = vrot.slane %v1759_v34, 1  ;;  %v627_v1 = vrot.slane %v1759_v34, 2 }
 0x169   : > { %v1763_v37 = vpop.f32.mrf.mxu0  ;;  %v1496_v39 = vpack.i.bf16 %v587_v36, %v585_v35  ;;  %v1501_v55 = vpack.i.bf16 %v622_v43, %v620_v45 }
 0x16a   : > { %v588_v41 = vrot.slane %v1763_v37, 1  ;;  %v623_v42 = vrot.slane %v1763_v37, 2  ;;  %v593_v3 = vsel %vm570_vm8, %v590_v40, %v592_v47  ;;  %v628_v16 = vsel %vm605_vm9, %v625_v46, %v627_v1 }
 0x16b   : > { %1492 = vrot.lane.b32.xlu0 %v1491_v38, %s1581_s15  ;;  %1497 = vrot.lane.b32.xlu1 %v1496_v39, %s1580_s14  ;;  %v1771_v44 = vpop.f32.mrf.mxu0 }
 0x16c   : > { %v589_v48 = vsel %vm570_vm8, %v586_v29, %v588_v41  ;;  %v591_v49 = vsel %vm570_vm8, %v588_v41, %v590_v40  ;;  %v624_v61 = vsel %vm605_vm9, %v621_v30, %v623_v42  ;;  %v626_v63 = vsel %vm605_vm9, %v623_v42, %v625_v46 }
 0x16d   : > { %v1778_v53 = vpop.f32.mrf.mxu0  ;;  %v1506_v57 = vpack.i.bf16 %v591_v49, %v589_v48  ;;  %v598_v5 = vrot.slane %v1771_v44, 1  ;;  %v1511_v7 = vpack.i.bf16 %v626_v63, %v624_v61  ;;  %v633_v15 = vrot.slane %v1771_v44, 2  ;;  %v1565_v48 = vld [vmem:[%s1968_s4 + $0x20] sm:$0xff]  }
 0x16e   : > { %v594_v58 = vrot.slane %v1778_v53, 1  ;;  %v629_v59 = vrot.slane %v1778_v53, 2 }
 0x16f   : > { %1502 = vrot.lane.b32.xlu1 %v1501_v55, %s1581_s15  ;;  %1507 = vrot.lane.b32.xlu0 %v1506_v57, %s1580_s14  ;;  %v1786_v0 = vpop.f32.mrf.mxu0 }
 0x170   : > { %v595_v4 = vsel %vm570_vm8, %v592_v47, %v594_v58  ;;  %v600_v10 = vrot.slane %v1786_v0, 1  ;;  %v630_v14 = vsel %vm605_vm9, %v627_v1, %v629_v59  ;;  %v635_v20 = vrot.slane %v1786_v0, 2 }
 0x171   : > { %v1792_v6 = vpop.f32.mrf.mxu0  ;;  %v1516_v8 = vpack.i.bf16 %v595_v4, %v593_v3  ;;  %v1521_v21 = vpack.i.bf16 %v630_v14, %v628_v16 }
 0x172   : > { %v596_v11 = vrot.slane %v1792_v6, 1  ;;  %v631_v13 = vrot.slane %v1792_v6, 2  ;;  %v601_v23 = vsel %vm570_vm8, %v598_v5, %v600_v10  ;;  %v604_v24 = vsel %vm570_vm8, %v600_v10, %v571_v56 }
 0x173   : > { %1512 = vrot.lane.b32.xlu0 %v1511_v7, %s1581_s15  ;;  %1517 = vrot.lane.b32.xlu1 %v1516_v8, %s1580_s14  ;;  %v1526_v29 = vpack.i.bf16 %v604_v24, %v601_v23  ;;  %v636_v31 = vsel %vm605_vm9, %v633_v15, %v635_v20  ;;  %v639_v32 = vsel %vm605_vm9, %v635_v20, %v606_v62 }
 0x174   : > { %v597_v17 = vsel %vm570_vm8, %v594_v58, %v596_v11  ;;  %v599_v18 = vsel %vm570_vm8, %v596_v11, %v598_v5  ;;  %v632_v27 = vsel %vm605_vm9, %v629_v59, %v631_v13  ;;  %v634_v28 = vsel %vm605_vm9, %v631_v13, %v633_v15 }
 0x175   : > { %v1531_v22 = vpack.i.bf16 %v599_v18, %v597_v17  ;;  %v1536_v30 = vpack.i.bf16 %v634_v28, %v632_v27  ;;  %v1541_v56 = vpack.i.bf16 %v639_v32, %v636_v31 }
 0x177   : > { %1522 = vrot.lane.b32.xlu1 %v1521_v21, %s1581_s15  ;;  %1532 = vrot.lane.b32.xlu0 %v1531_v22, %s1580_s14 }
 0x17b   : > { %1527 = vrot.lane.b32.xlu1 %v1526_v29, %s1580_s14  ;;  %1537 = vrot.lane.b32.xlu0 %v1536_v30, %s1581_s15 }
 0x17f   : > { %1542 = vrot.lane.b32.xlu1 %v1541_v56, %s1581_s15 }
 0x1d1   : > { %v1468_v33 = vpop.permute.xlu0 %1467 }
 0x1d2   : > { %v1470_v35 = vunpack.i.h.bf16 %v1468_v33  ;;  %v1469_v36 = vunpack.i.l.bf16 %v1468_v33 }
 0x1d4   : > { %v739_v62 = vsel %vm738_vm10, %v1696_v51, %v1469_v36  ;;  %v740_v45 = vsel %vm738_vm10, %v1703_v54, %v1470_v35 }
 0x1d5   : > { %v1478_v38 = vpop.permute.xlu1 %1477  ;;  %v1473_v39 = vpop.permute.xlu0 %1472 }
 0x1d6   : > { %v1475_v40 = vunpack.i.h.bf16 %v1473_v39  ;;  %v1474_v41 = vunpack.i.l.bf16 %v1473_v39  ;;  %v1480_v42 = vunpack.i.h.bf16 %v1478_v38  ;;  %v1479_v43 = vunpack.i.l.bf16 %v1478_v38 }
 0x1d8   : > { %v756_v46 = vsel %vm755_vm11, %v739_v62, %v1474_v41  ;;  %v757_v47 = vsel %vm755_vm11, %v740_v45, %v1475_v40  ;;  %v742_v61 = vsel %vm738_vm10, %v1698_v52, %v1480_v42  ;;  %v741_v51 = vsel %vm738_vm10, %v1694_v50, %v1479_v43 }
 0x1d9   : > { %v1483_v49 = vpop.permute.xlu1 %1482  ;;  %v1488_v55 = vpop.permute.xlu0 %1487  ;;  %v1290_v57 = vpack.c.bf16 %v757_v47, %v756_v46 }
 0x1da   : > { %v1485_v58 = vunpack.i.h.bf16 %v1483_v49  ;;  %v1484_v59 = vunpack.i.l.bf16 %v1483_v49  ;;  %v1490_v54 = vunpack.i.h.bf16 %v1488_v55  ;;  %v1489_v63 = vunpack.i.l.bf16 %v1488_v55 }
 0x1db   : > { %1414 = vmatprep.mubr.msk.bf16.mxu1 %vm1826_vm13, %v1290_v57 }
 0x1dc   : > { %v758_v1 = vsel %vm755_vm11, %v741_v51, %v1484_v59  ;;  %v759_v3 = vsel %vm755_vm11, %v742_v61, %v1485_v58  ;;  %v744_v52 = vsel %vm738_vm10, %v1735_v12, %v1490_v54  ;;  %v743_v50 = vsel %vm738_vm10, %v1721_v2, %v1489_v63 }
 0x1dd   : > { %v1293_v4 = vpack.c.bf16 %v759_v3, %v758_v1  ;;  %v1498_v5 = vpop.permute.xlu1 %1497  ;;  %v1493_v7 = vpop.permute.xlu0 %1492 }
 0x1de   : > { %v1495_v8 = vunpack.i.h.bf16 %v1493_v7  ;;  %v1494_v10 = vunpack.i.l.bf16 %v1493_v7  ;;  %v1500_v11 = vunpack.i.h.bf16 %v1498_v5  ;;  %v1499_v13 = vunpack.i.l.bf16 %v1498_v5 }
 0x1df   : > { %1415 = vmatmul.mubr.msk.bf16.vlgmr.msra.gmra.mxu1 %vm1826_vm13, %v1293_v4 }
 0x1e0   : > { %v760_v14 = vsel %vm755_vm11, %v743_v50, %v1494_v10  ;;  %v761_v15 = vsel %vm755_vm11, %v744_v52, %v1495_v8  ;;  %v746_v12 = vsel %vm738_vm10, %v1731_v9, %v1500_v11  ;;  %v745_v2 = vsel %vm738_vm10, %v1710_v60, %v1499_v13  ;;  %v1562_v10 = vld [vmem:[%s1968_s4 + $0x38] sm:$0xff]   ;;  %v1567_v11 = vld [vmem:[%s1968_s4 + $0x10] sm:$0xff]   ;;  %v1568_v13 = vld [vmem:[%s1968_s4 + $0x8] sm:$0xff]  }
 0x1e1   : > { %v1296_v16 = vpack.c.bf16 %v761_v15, %v760_v14  ;;  %v1503_v17 = vpop.permute.xlu1 %1502  ;;  %v1508_v18 = vpop.permute.xlu0 %1507  ;;  %v1582_v52 = vmov 0.0   ;;  %v1566_v50 = vld [vmem:[%s1968_s4 + $0x18] sm:$0xff]   ;;  %v1569_v14 = vld [vmem:[%s1968_s4] sm:$0xff]   ;;  %v981_v15 = vshrl.u32 %v269_v25, 7 }
 0x1e2   : > { %v1505_v20 = vunpack.i.h.bf16 %v1503_v17  ;;  %v1504_v21 = vunpack.i.l.bf16 %v1503_v17  ;;  %v1510_v22 = vunpack.i.h.bf16 %v1508_v18  ;;  %v1509_v23 = vunpack.i.l.bf16 %v1508_v18  ;;  %1430 = vmatprep.subr.bf16.mxu0 %v1582_v52  ;;  %1446 = vmatprep.mubr.msk.bf16.mxu0 %vm1583_vm14, %v1582_v52  ;;  %v1916_v17 = vld [vmem:[%s1967_s3] ss:$0 sm:$0xff] }
 0x1e3   : > { %1418 = vmatprep.mubr.msk.bf16.mxu1 %vm1826_vm13, %v1296_v16  ;;  %1431 = vmatpush3.bf16.msra.mxu0 %v1562_v10 }
 0x1e4   : > { %v762_v24 = vsel %vm755_vm11, %v745_v2, %v1504_v21  ;;  %v763_v27 = vsel %vm755_vm11, %v746_v12, %v1505_v20  ;;  %v748_v9 = vsel %vm738_vm10, %v1763_v37, %v1510_v22  ;;  %v747_v60 = vsel %vm738_vm10, %v1750_v26, %v1509_v23  ;;  %1432 = vmatprep.subr.bf16.mxu0 %v1582_v52 }
 0x1e5   : > { %v1299_v28 = vpack.c.bf16 %v763_v27, %v762_v24  ;;  %v1518_v29 = vpop.permute.xlu1 %1517  ;;  %v1513_v30 = vpop.permute.xlu0 %1512  ;;  %v1918_v20 = vadd.s32 8, %v981_v15 }
 0x1e6   : > { %v1515_v31 = vunpack.i.h.bf16 %v1513_v30  ;;  %v1514_v32 = vunpack.i.l.bf16 %v1513_v30  ;;  %v1520_v56 = vunpack.i.h.bf16 %v1518_v29  ;;  %v1519_v33 = vunpack.i.l.bf16 %v1518_v29 }
 0x1e7   : > { %1419 = vmatmul.mubr.msk.bf16.gmra.mxu1 %vm1826_vm13, %v1299_v28  ;;  %vm984_vm15 = vcmp.lt.s32.totalorder %v1918_v20, 14 }
 0x1e8   : > { %v764_v35 = vsel %vm755_vm11, %v747_v60, %v1514_v32  ;;  %v765_v36 = vsel %vm755_vm11, %v748_v9, %v1515_v31  ;;  %v750_v37 = vsel %vm738_vm10, %v1759_v34, %v1520_v56  ;;  %v749_v26 = vsel %vm738_vm10, %v1743_v19, %v1519_v33 }
 0x1e9   : > { %v1302_v38 = vpack.c.bf16 %v765_v36, %v764_v35  ;;  %v1523_v39 = vpop.permute.xlu1 %1522  ;;  %v1533_v40 = vpop.permute.xlu0 %1532 }
 0x1ea   : > { %v1525_v41 = vunpack.i.h.bf16 %v1523_v39  ;;  %v1524_v42 = vunpack.i.l.bf16 %v1523_v39  ;;  %v1535_v43 = vunpack.i.h.bf16 %v1533_v40  ;;  %v1534_v62 = vunpack.i.l.bf16 %v1533_v40 }
 0x1eb   : > { %1422 = vmatprep.mubr.msk.bf16.mxu1 %vm1826_vm13, %v1302_v38 }
 0x1ec   : > { %v766_v45 = vsel %vm755_vm11, %v749_v26, %v1524_v42  ;;  %v767_v46 = vsel %vm755_vm11, %v750_v37, %v1525_v41  ;;  %v752_v34 = vsel %vm738_vm10, %v1792_v6, %v1535_v43  ;;  %v751_v19 = vsel %vm738_vm10, %v1778_v53, %v1534_v62 }
 0x1ed   : > { %v1305_v47 = vpack.c.bf16 %v767_v46, %v766_v45  ;;  %v1528_v49 = vpop.permute.xlu1 %1527  ;;  %v1538_v55 = vpop.permute.xlu0 %1537 }
 0x1ee   : > { %v1540_v57 = vunpack.i.h.bf16 %v1538_v55  ;;  %v1539_v58 = vunpack.i.l.bf16 %v1538_v55  ;;  %v1530_v59 = vunpack.i.h.bf16 %v1528_v49  ;;  %v1529_v61 = vunpack.i.l.bf16 %v1528_v49 }
 0x1ef   : > { %1423 = vmatmul.mubr.msk.bf16.gmra.mxu1 %vm1826_vm13, %v1305_v47 }
 0x1f0   : > { %v768_v51 = vsel %vm755_vm11, %v751_v19, %v1539_v58  ;;  %v769_v54 = vsel %vm755_vm11, %v752_v34, %v1540_v57  ;;  %v754_v5 = vsel %vm738_vm10, %v1786_v0, %v1530_v59  ;;  %v753_v6 = vsel %vm738_vm10, %v1771_v44, %v1529_v61  ;;  %v1563_v44 = vld [vmem:[%s1968_s4 + $0x30] sm:$0xff]   ;;  %v1564_v0 = vld [vmem:[%s1968_s4 + $0x28] sm:$0xff]  }
 0x1f1   : > { %v1308_v63 = vpack.c.bf16 %v769_v54, %v768_v51  ;;  %v1543_v1 = vpop.permute.xlu1 %1542  ;;  %1433 = vmatpush3.bf16.msra.mxu0 %v1563_v44 }
 0x1f2   : > { %v1545_v3 = vunpack.i.h.bf16 %v1543_v1  ;;  %v1544_v4 = vunpack.i.l.bf16 %v1543_v1  ;;  %1434 = vmatprep.subr.bf16.mxu0 %v1582_v52 }
 0x1f3   : > { %1426 = vmatprep.mubr.msk.bf16.mxu1 %vm1826_vm13, %v1308_v63 }
 0x1f4   : > { %v770_v53 = vsel %vm755_vm11, %v753_v6, %v1544_v4  ;;  %v771_v7 = vsel %vm755_vm11, %v754_v5, %v1545_v3 }
 0x1f5   : > { %v1311_v8 = vpack.c.bf16 %v771_v7, %v770_v53  ;;  %1435 = vmatpush3.bf16.msra.mxu0 %v1564_v0 }
 0x1f6   : > { %1436 = vmatprep.subr.bf16.mxu0 %v1582_v52 }
 0x1f7   : > { %1427 = vmatmul.mubr.msk.bf16.gmra.mxu1 %vm1826_vm13, %v1311_v8 }
 0x1f9   : > { %1437 = vmatpush3.bf16.msra.mxu0 %v1565_v48 }
 0x1fa   : > { %1438 = vmatprep.subr.bf16.mxu0 %v1582_v52 }
 0x1fd   : > { %1439 = vmatpush3.bf16.msra.mxu0 %v1566_v50 }
 0x1fe   : > { %1440 = vmatprep.subr.bf16.mxu0 %v1582_v52 }
 0x201   : > { %1441 = vmatpush3.bf16.msra.mxu0 %v1567_v11 }
 0x202   : > { %1442 = vmatprep.subr.bf16.mxu0 %v1582_v52 }
 0x205   : > { %1443 = vmatpush3.bf16.msra.mxu0 %v1568_v13 }
 0x206   : > { %1444 = vmatprep.subr.bf16.mxu0 %v1582_v52 }
 0x209   : > { %1445 = vmatpush3.bf16.msra.mxu0 %v1569_v14 }
 0x29f   : > { %v1416_v16 = vpop.f32.mrf.mxu1 }
 0x2a0   : > { %v950_v21 = vadd.f32 %v1416_v16, %v1916_v17 }
 0x2a1   : > { %v879_v18 = vpop.f32.mrf.mxu1 }
 0x2a2   : > { %v948_v22 = vadd.f32 %v1916_v17, %v879_v18  ;;  %v966_v27 = vmax.f32 %v950_v21, 0.0 }
 0x2a3   : > { %v1417_v12 = vpop.f32.mrf.mxu1 }
 0x2a4   : > { %v951_v2 = vadd.f32 %v1417_v12, %v1916_v17  ;;  %v964_v31 = vmax.f32 %v948_v22, 0.0 }
 0x2a5   : > { %v882_v23 = vpop.f32.mrf.mxu1 }
 0x2a6   : > { %v967_v25 = vmax.f32 %v951_v2, 0.0  ;;  %v949_v24 = vadd.f32 %v1916_v17, %v882_v23 }
 0x2a7   : > { %v1420_v28 = vpop.f32.mrf.mxu1 }
 0x2a8   : > { %v992_v29 = vsel %vm984_vm15, %v967_v25, 0.0  ;;  %v965_v30 = vmax.f32 %v949_v24, 0.0  ;;  %v954_v33 = vadd.f32 %v1420_v28, %v1916_v17 }
 0x2a9   : > { %v1012_v32 = vmax.f32 %v966_v27, %v992_v29  ;;  %v895_v9 = vpop.f32.mrf.mxu1 }
 0x2aa   : > { %v990_v60 = vsel %vm984_vm15, %v965_v30, 0.0  ;;  %v952_v40 = vadd.f32 %v1916_v17, %v895_v9  ;;  %v970_v26 = vmax.f32 %v954_v33, 0.0 }
 0x2ab   : > { %v1005_v56 = vmax.f32 %v964_v31, %v990_v60  ;;  %v1421_v35 = vpop.f32.mrf.mxu1  ;;  %v1013_v38 = vrot.slane %v1012_v32, 4 }
 0x2ac   : > { %v955_v36 = vadd.f32 %v1421_v35, %v1916_v17  ;;  %v968_v49 = vmax.f32 %v952_v40, 0.0 }
 0x2ad   : > { %v1006_v39 = vrot.slane %v1005_v56, 4  ;;  %v898_v41 = vpop.f32.mrf.mxu1  ;;  %v1014_v47 = vmax.f32 %v1012_v32, %v1013_v38 }
 0x2ae   : > { %v971_v42 = vmax.f32 %v955_v36, 0.0  ;;  %v953_v37 = vadd.f32 %v1916_v17, %v898_v41 }
 0x2af   : > { %v1424_v43 = vpop.f32.mrf.mxu1  ;;  %v1007_v62 = vmax.f32 %v1005_v56, %v1006_v39  ;;  %v1015_v63 = vrot.slane %v1014_v47, 2 }
 0x2b0   : > { %v996_v45 = vsel %vm984_vm15, %v971_v42, 0.0  ;;  %v969_v46 = vmax.f32 %v953_v37, 0.0  ;;  %v958_v51 = vadd.f32 %v1424_v43, %v1916_v17 }
 0x2b1   : > { %v1026_v55 = vmax.f32 %v970_v26, %v996_v45  ;;  %v911_v57 = vpop.f32.mrf.mxu1  ;;  %v1008_v61 = vrot.slane %v1007_v62, 2  ;;  %v1016_v48 = vmax.f32 %v1014_v47, %v1015_v63 }
 0x2b2   : > { %v994_v58 = vsel %vm984_vm15, %v969_v46, 0.0  ;;  %v956_v3 = vadd.f32 %v1916_v17, %v911_v57  ;;  %v974_v52 = vmax.f32 %v958_v51, 0.0 }
 0x2b3   : > { %v1027_v34 = vrot.slane %v1026_v55, 4  ;;  %v1019_v19 = vmax.f32 %v968_v49, %v994_v58  ;;  %v1425_v59 = vpop.f32.mrf.mxu1  ;;  %v1009_v10 = vmax.f32 %v1007_v62, %v1008_v61  ;;  %v1017_v24 = vrot.slane %v1016_v48, 1 }
 0x2b4   : > { %v959_v54 = vadd.f32 %v1425_v59, %v1916_v17  ;;  %v972_v11 = vmax.f32 %v956_v3, 0.0 }
 0x2b5   : > { %v1020_v1 = vrot.slane %v1019_v19, 4  ;;  %v914_v4 = vpop.f32.mrf.mxu1  ;;  %v1028_v5 = vmax.f32 %v1026_v55, %v1027_v34  ;;  %v1010_v22 = vrot.slane %v1009_v10, 1  ;;  %v1018_v26 = vmax.f32 %v1016_v48, %v1017_v24 }
 0x2b6   : > { %v975_v6 = vmax.f32 %v959_v54, 0.0  ;;  %v957_v53 = vadd.f32 %v1916_v17, %v914_v4 }
 0x2b7   : > { %v1021_v7 = vmax.f32 %v1019_v19, %v1020_v1  ;;  %v1428_v8 = vpop.f32.mrf.mxu1  ;;  %v1029_v14 = vrot.slane %v1028_v5, 2  ;;  %v1011_v35 = vmax.f32 %v1009_v10, %v1010_v22  ;;  %v1062_v19 = vpack.c.bf16 %v1018_v26, %v1018_v26 }
 0x2b8   : > { %v1000_v44 = vsel %vm984_vm15, %v975_v6, 0.0  ;;  %v973_v0 = vmax.f32 %v957_v53, 0.0  ;;  %v962_v12 = vadd.f32 %v1428_v8, %v1916_v17 }
 0x2b9   : > { %v1022_v50 = vrot.slane %v1021_v7, 2  ;;  %v927_v13 = vpop.f32.mrf.mxu1  ;;  %v1040_v15 = vmax.f32 %v974_v52, %v1000_v44  ;;  %v1030_v31 = vmax.f32 %v1028_v5, %v1029_v14  ;;  %v1061_v49 = vpack.c.bf16 %v1011_v35, %v1011_v35 }
 0x2ba   : > { %v998_v16 = vsel %vm984_vm15, %v973_v0, 0.0  ;;  %v960_v29 = vadd.f32 %v1916_v17, %v927_v13  ;;  %v978_v33 = vmax.f32 %v962_v12, 0.0  ;;  %v1084_v6 = vunpack.c.l.b16 %v1062_v19 }
 0x2bb   : > { %v1023_v18 = vmax.f32 %v1021_v7, %v1022_v50  ;;  %v1033_v21 = vmax.f32 %v972_v11, %v998_v16  ;;  %v1429_v2 = vpop.f32.mrf.mxu1  ;;  %v1041_v23 = vrot.slane %v1040_v15, 4  ;;  %v1031_v43 = vrot.slane %v1030_v31, 1 }
 0x2bc   : > { %v963_v25 = vadd.f32 %v1429_v2, %v1916_v17  ;;  %v976_v42 = vmax.f32 %v960_v29, 0.0  ;;  %v1083_v1 = vunpack.c.l.b16 %v1061_v49 }
 0x2bd   : > { %v1024_v27 = vrot.slane %v1023_v18, 1  ;;  %v1034_v28 = vrot.slane %v1033_v21, 4  ;;  %v930_v30 = vpop.f32.mrf.mxu1  ;;  %v1042_v32 = vmax.f32 %v1040_v15, %v1041_v23  ;;  %v1032_v59 = vmax.f32 %v1030_v31, %v1031_v43 }
 0x2be   : > { %v979_v9 = vmax.f32 %v963_v25, 0.0  ;;  %v961_v60 = vadd.f32 %v1916_v17, %v930_v30  ;;  %v1092_v52 = vsel %vm1091_vm0, %v1084_v6, %v1083_v1 }
 0x2bf   : > { %v1035_v56 = vmax.f32 %v1033_v21, %v1034_v28  ;;  %v1043_v36 = vrot.slane %v1042_v32, 2  ;;  %v1025_v40 = vmax.f32 %v1023_v18, %v1024_v27  ;;  %v1064_v53 = vpack.c.bf16 %v1032_v59, %v1032_v59  ;;  %v1314_v28 = vld [vmem:[%s1969_s5] ss:$0 sm:$0xff] }
 0x2c0   : > { %v1004_v38 = vsel %vm984_vm15, %v979_v9, 0.0  ;;  %v977_v39 = vmax.f32 %v961_v60, 0.0 }
 0x2c1   : > { %v1036_v41 = vrot.slane %v1035_v56, 2  ;;  %v1054_v37 = vmax.f32 %v978_v33, %v1004_v38  ;;  %v1044_v62 = vmax.f32 %v1042_v32, %v1043_v36  ;;  %v1063_v55 = vpack.c.bf16 %v1025_v40, %v1025_v40 }
 0x2c2   : > { %v1002_v45 = vsel %vm984_vm15, %v977_v39, 0.0  ;;  %v1086_v11 = vunpack.c.l.b16 %v1064_v53 }
 0x2c3   : > { %v1037_v46 = vmax.f32 %v1035_v56, %v1036_v41  ;;  %v1055_v17 = vrot.slane %v1054_v37, 4  ;;  %v1047_v47 = vmax.f32 %v976_v42, %v1002_v45  ;;  %v1045_v61 = vrot.slane %v1044_v62, 1 }
 0x2c4   : > { %v1085_v3 = vunpack.c.l.b16 %v1063_v55 }
 0x2c5   : > { %v1038_v57 = vrot.slane %v1037_v46, 1  ;;  %v1056_v58 = vmax.f32 %v1054_v37, %v1055_v17  ;;  %v1048_v34 = vrot.slane %v1047_v47, 4  ;;  %v1046_v7 = vmax.f32 %v1044_v62, %v1045_v61 }
 0x2c6   : > { %v1094_v44 = vsel %vm1093_vm1, %v1085_v3, %v1092_v52 }
 0x2c7   : > { %v1039_v51 = vmax.f32 %v1037_v46, %v1038_v57  ;;  %v1057_v54 = vrot.slane %v1056_v58, 2  ;;  %v1049_v63 = vmax.f32 %v1047_v47, %v1048_v34  ;;  %v1066_v13 = vpack.c.bf16 %v1046_v7, %v1046_v7 }
 0x2c8   : > { %v1096_v15 = vsel %vm1095_vm2, %v1086_v11, %v1094_v44 }
 0x2c9   : > { %v1065_v4 = vpack.c.bf16 %v1039_v51, %v1039_v51  ;;  %v1058_v20 = vmax.f32 %v1056_v58, %v1057_v54  ;;  %v1050_v5 = vrot.slane %v1049_v63, 2  ;;  %v1088_v12 = vunpack.c.l.b16 %v1066_v13 }
 0x2cb   : > { %v1059_v8 = vrot.slane %v1058_v20, 1  ;;  %v1051_v10 = vmax.f32 %v1049_v63, %v1050_v5  ;;  %v1087_v0 = vunpack.c.l.b16 %v1065_v4 }
 0x2cd   : > { %v1060_v48 = vmax.f32 %v1058_v20, %v1059_v8  ;;  %v1052_v50 = vrot.slane %v1051_v10, 1  ;;  %v1098_v18 = vsel %vm1097_vm3, %v1087_v0, %v1096_v15 }
 0x2ce   : > { %v1100_v23 = vsel %vm1099_vm4, %v1088_v12, %v1098_v18 }
 0x2cf   : > { %v1053_v14 = vmax.f32 %v1051_v10, %v1052_v50  ;;  %v1068_v16 = vpack.c.bf16 %v1060_v48, %v1060_v48 }
 0x2d1   : > { %v1067_v21 = vpack.c.bf16 %v1053_v14, %v1053_v14  ;;  %v1090_v22 = vunpack.c.l.b16 %v1068_v16 }
 0x2d3   : > { %v1089_v2 = vunpack.c.l.b16 %v1067_v21 }
 0x2d5   : > { %v1102_v25 = vsel %vm1101_vm5, %v1089_v2, %v1100_v23 }
 0x2d6   : > { %v1104_v24 = vsel %vm1103_vm6, %v1090_v22, %v1102_v25 }
 0x2d7   : > { %v1105_v27 = vpack.c.b16 %v1104_v24, %v1104_v24 }
 0x2d9   : > { %1447 = vmatmul.mubr.bf16.vlgmr.msra.gmra.mxu0 %v1105_v27 }
 0x399   : > { %v1189_v29 = vpop.f32.mrf.mxu0 }
 0x39a   : > { %v1190_v30 = vadd.f32 %v1314_v28, %v1189_v29 }
 0x39b   : > { %v1448_v31 = vpop.f32.mrf.mxu0 }
 0x39c   : > { %1195 = vst [vmem:[%s251_s17] sm:$0xff] %v1190_v30 }
 0x39d   : > { %v1192_v32 = vpop.f32.mrf.mxu0 }
 0x39f   : > { %v1449_v9 = vpop.f32.mrf.mxu0 }
 0x3a0 PF: > { %s16_s21 = sadd.s32 1, %s1576_s21  }
 0x3a1   : > { %p13_p5 = scmp.ge.s32.totalorder %s16_s21, 4  }
 0x3a3   :  { %15 = sbr.rel (!%p13_p5) target bundleno = 1 (0x1), region = 74 }

</bundles_post_ra>
